<compile_context>
chip_gen: v7x
topology: tpu7x:2x2x1
jax: 0.10.0
libtpu: 0.0.40
codegen_flags: <defaults>
</compile_context>

<pallas_src>
import jax
import jax.numpy as jnp
from jax.experimental import pallas as pl
from jax.experimental.pallas import tpu as pltpu


# ----------------------------------------------------------------------------- fused SE kernel
def _se_kernel(x_ref, w1t_ref, w2_ref, o_ref):
    # x_ref  : (C, HW)   one batch element, lane-dense on HW
    # w1t_ref: (C, Cr)   = W1.T   (PyTorch Linear(C, C//r).weight is (Cr, C))
    # w2_ref : (C, Cr)   = W2     (PyTorch Linear(C//r, C).weight is (C, Cr))
    x = x_ref[...]                                               # (C, HW)

    # AdaptiveAvgPool2d(1): mean over the lane (spatial) axis -> (C, 1)
    pooled = jnp.mean(x, axis=1, keepdims=True)                  # (C, 1)

    # FC1 + ReLU:  h1[r] = relu( sum_c pooled[c] * W1[r, c] )
    #   pooled (C,1) lane-broadcasts against w1t (C, Cr); sublane reduction.
    h1 = jnp.sum(pooled * w1t_ref[...], axis=0, keepdims=True)   # (1, Cr)
    h1 = jnp.maximum(h1, 0.0)

    # FC2 + Sigmoid:  s[c] = sigmoid( sum_r W2[c, r] * h1[r] )
    #   h1 (1,Cr) sublane-broadcasts against w2 (C, Cr); lane reduction.
    s = jnp.sum(w2_ref[...] * h1, axis=1, keepdims=True)         # (C, 1)
    s = jax.nn.sigmoid(s)

    # Channel-wise scale of the full feature map (lane broadcast of s).
    o_ref[...] = x * s


def se_block(x, w1, w2):
    """SEBlock forward.

    x : (B, C, H, W)  float
    w1: (C//r, C)     Linear(channel, channel // reduction, bias=False).weight
    w2: (C, C//r)     Linear(channel // reduction, channel, bias=False).weight
    """
    B, C, H, W = x.shape
    HW = H * W
    Cr = w1.shape[0]
    assert w1.shape == (Cr, C) and w2.shape == (C, Cr)

    x2 = x.reshape(B, C, HW).astype(jnp.float32)
    w1t = jnp.transpose(w1).astype(jnp.float32)   # (C, Cr)
    w2f = w2.astype(jnp.float32)                  # (C, Cr)

    out = pl.pallas_call(
        _se_kernel,
        grid=(B,),
        in_specs=[
            pl.BlockSpec((None, C, HW), lambda b: (b, 0, 0)),   # one batch per step
            pl.BlockSpec((C, Cr), lambda b: (0, 0)),            # weights resident
            pl.BlockSpec((C, Cr), lambda b: (0, 0)),
        ],
        out_specs=pl.BlockSpec((None, C, HW), lambda b: (b, 0, 0)),
        out_shape=jax.ShapeDtypeStruct((B, C, HW), jnp.float32),
        compiler_params=pltpu.CompilerParams(
            dimension_semantics=("parallel",),                  # v7x: shard batches over 2 TCs
        ),
    )(x2, w1t, w2f)

    return out.reshape(B, C, H, W).astype(x.dtype)


# ----------------------------------------------------------------------------- pure-JAX reference
def se_block_ref(x, w1, w2):
    y = jnp.mean(x, axis=(2, 3))                       # (B, C)
    y = jnp.maximum(y @ w1.T, 0.0)                     # (B, C//r)
    y = jax.nn.sigmoid(y @ w2.T)                       # (B, C)
    return x * y[:, :, None, None]


# ----------------------------------------------------------------------------- main
if __name__ == "__main__":
    key = jax.random.PRNGKey(0)
    k_x, k_w1, k_w2 = jax.random.split(key, 3)

    B, C, H, W = 2, 32, 16, 16          # channels >= reduction so C//16 = 2
    reduction = 16
    Cr = C // reduction

    x = jax.random.normal(k_x, (B, C, H, W), dtype=jnp.float32)
    w1 = 0.1 * jax.random.normal(k_w1, (Cr, C), dtype=jnp.float32)   # Linear(C, C//r).weight
    w2 = 0.1 * jax.random.normal(k_w2, (C, Cr), dtype=jnp.float32)   # Linear(C//r, C).weight

    fwd = jax.jit(se_block)
    out = jax.block_until_ready(fwd(x, w1, w2))

    ref = se_block_ref(x, w1, w2)
    assert out.shape == (B, C, H, W), out.shape
    assert bool(jnp.all(jnp.isfinite(out)))
    assert bool(jnp.allclose(out, ref, rtol=1e-5, atol=1e-5)), float(jnp.max(jnp.abs(out - ref)))
    print("KERNEL_OK")
</pallas_src>

<mosaic_0001>
module attributes {stable_mosaic.version = 11 : i64} {
  func.func @_se_kernel(%arg0: i32, %arg1: memref<1x32x256xf32, #tpu.memory_space<vmem>>, %arg2: memref<32x2xf32, #tpu.memory_space<vmem>>, %arg3: memref<32x2xf32, #tpu.memory_space<vmem>>, %arg4: memref<1x32x256xf32, #tpu.memory_space<vmem>>) attributes {dimension_semantics = [#tpu.dimension_semantics<parallel>], iteration_bounds = array<i64: 2>, scalar_prefetch = 0 : i64, scratch_operands = 0 : i64, tpu.core_type = #tpu.core_type<tc>, window_params = [{transform_indices = @transform_0, window_bounds = array<i64: 1, 32, 256>}, {pipeline_mode = #tpu.pipeline_mode<synchronous>, transform_indices = @transform_1, window_bounds = array<i64: 32, 2>}, {pipeline_mode = #tpu.pipeline_mode<synchronous>, transform_indices = @transform_2, window_bounds = array<i64: 32, 2>}, {transform_indices = @transform_3, window_bounds = array<i64: 1, 32, 256>}]} {
    %c0 = arith.constant 0 : index
    %c0_0 = arith.constant 0 : index
    %c0_1 = arith.constant 0 : index
    %0 = vector.load %arg1[%c0, %c0_0, %c0_1] : memref<1x32x256xf32, #tpu.memory_space<vmem>>, vector<1x32x256xf32>
    %1 = vector.shape_cast %0 : vector<1x32x256xf32> to vector<32x256xf32>
    %cst = arith.constant dense<0.000000e+00> : vector<32xf32>
    %2 = vector.multi_reduction <add>, %1, %cst [1] : vector<32x256xf32> to vector<32xf32>
    %3 = vector.shape_cast %2 : vector<32xf32> to vector<32x1xf32>
    %cst_2 = arith.constant 2.560000e+02 : f32
    %4 = vector.broadcast %cst_2 : f32 to vector<32x1xf32>
    %5 = arith.divf %3, %4 : vector<32x1xf32>
    %c0_3 = arith.constant 0 : index
    %c0_4 = arith.constant 0 : index
    %6 = vector.load %arg2[%c0_3, %c0_4] : memref<32x2xf32, #tpu.memory_space<vmem>>, vector<32x2xf32>
    %7 = vector.broadcast %5 : vector<32x1xf32> to vector<32x2xf32>
    %8 = arith.mulf %7, %6 : vector<32x2xf32>
    %cst_5 = arith.constant dense<0.000000e+00> : vector<2xf32>
    %9 = vector.multi_reduction <add>, %8, %cst_5 [0] : vector<32x2xf32> to vector<2xf32>
    %10 = vector.shape_cast %9 : vector<2xf32> to vector<1x2xf32>
    %cst_6 = arith.constant 0.000000e+00 : f32
    %11 = vector.broadcast %cst_6 : f32 to vector<1x2xf32>
    %12 = arith.maximumf %10, %11 : vector<1x2xf32>
    %c0_7 = arith.constant 0 : index
    %c0_8 = arith.constant 0 : index
    %13 = vector.load %arg3[%c0_7, %c0_8] : memref<32x2xf32, #tpu.memory_space<vmem>>, vector<32x2xf32>
    %14 = vector.broadcast %12 : vector<1x2xf32> to vector<32x2xf32>
    %15 = arith.mulf %13, %14 : vector<32x2xf32>
    %cst_9 = arith.constant dense<0.000000e+00> : vector<32xf32>
    %16 = vector.multi_reduction <add>, %15, %cst_9 [1] : vector<32x2xf32> to vector<32xf32>
    %17 = vector.shape_cast %16 : vector<32xf32> to vector<32x1xf32>
    %18 = arith.negf %17 : vector<32x1xf32>
    %19 = math.exp %18 : vector<32x1xf32>
    %cst_10 = arith.constant 1.000000e+00 : f32
    %20 = vector.broadcast %cst_10 : f32 to vector<32x1xf32>
    %21 = arith.addf %20, %19 : vector<32x1xf32>
    %22 = arith.divf %20, %21 : vector<32x1xf32>
    %23 = vector.broadcast %22 : vector<32x1xf32> to vector<32x256xf32>
    %24 = arith.mulf %1, %23 : vector<32x256xf32>
    %c0_11 = arith.constant 0 : index
    %c0_12 = arith.constant 0 : index
    %c0_13 = arith.constant 0 : index
    %25 = vector.load %arg4[%c0_11, %c0_12, %c0_13] : memref<1x32x256xf32, #tpu.memory_space<vmem>>, vector<1x32x256xf32>
    %26 = vector.shape_cast %25 : vector<1x32x256xf32> to vector<32x256xf32>
    %27 = vector.shape_cast %24 : vector<32x256xf32> to vector<1x32x256xf32>
    tpu.vector_store %arg4[%c0_11, %c0_12, %c0_13], %27 {strides = array<i32>} : memref<1x32x256xf32, #tpu.memory_space<vmem>>, vector<1x32x256xf32>,
    return
  }
  func.func @transform_0(%arg0: i32) -> (i32, i32, i32) {
    %c0_i32 = arith.constant 0 : i32
    %c0_i32_0 = arith.constant 0 : i32
    %c0_i32_1 = arith.constant 0 : i32
    return %arg0, %c0_i32, %c0_i32_0 : i32, i32, i32
  }
  func.func @transform_1(%arg0: i32) -> (i32, i32) {
    %c0_i32 = arith.constant 0 : i32
    %c0_i32_0 = arith.constant 0 : i32
    %c0_i32_1 = arith.constant 0 : i32
    return %c0_i32, %c0_i32_0 : i32, i32
  }
  func.func @transform_2(%arg0: i32) -> (i32, i32) {
    %c0_i32 = arith.constant 0 : i32
    %c0_i32_0 = arith.constant 0 : i32
    %c0_i32_1 = arith.constant 0 : i32
    return %c0_i32, %c0_i32_0 : i32, i32
  }
  func.func @transform_3(%arg0: i32) -> (i32, i32, i32) {
    %c0_i32 = arith.constant 0 : i32
    %c0_i32_0 = arith.constant 0 : i32
    %c0_i32_1 = arith.constant 0 : i32
    return %arg0, %c0_i32, %c0_i32_0 : i32, i32, i32
  }
}

</mosaic_0001>

<bundles_post_ra>
// kernel: se_block.1
= control target key start
LH: loop header
LB: loop body
LE: loop exit
PB: predicated region body
PF: predicated region fallthrough
CT: control target
= control target key end

     0   :  { %s403_s12 = smov 0   ;;  %s491_s0 = inlined_call_operand.vmem [shape: f32[2,32,256], index: 0, kind: input, shape index: {}]   ;;  %s492_s1 = inlined_call_operand.vmem [shape: f32[32,2], index: 1, kind: input, shape index: {}]   ;;  %s493_s2 = inlined_call_operand.vmem [shape: f32[32,2], index: 2, kind: input, shape index: {}]   ;;  %s494_s3 = inlined_call_operand.vmem [shape: f32[2,32,256], index: 3, kind: output, shape index: {}]  }
   0x1 LB: > { %s334_s13 = sadd.s32 4294967295, %s381_s12   ;;  %p338_p0 = scmp.ge.s32.totalorder %s381_s12, 1  ;;  %s381_s12 = sphi %s403_s12, %s13_s12  }
   0x2   : > { %p137_p1 = scmp.lt.s32.totalorder %s381_s12, 3 }
   0x4   : > { %p138_p2 = pnand %p338_p0, %p137_p1 }
   0x5   : > { %p161_p3 = scmp.lt.s32.totalorder (!%p138_p2), %s334_s13, 1  ;;  %v196_v15 = vld [vmem:[%s492_s1] sm:$0xff] (!%p138_p2)  ;;  %v198_v17 = vld [vmem:[%s492_s1 + $0x10] sm:$0xff] (!%p138_p2)  ;;  %v197_v18 = vld [vmem:[%s492_s1 + $0x8] sm:$0xff] (!%p138_p2)  ;;  %vm204_vm0 = vcmask (!%p138_p2), 15360  }
   0x6   : > { %141 = sbr.rel (%p138_p2) target bundleno = 369 (0x171), region = 32  ;;  %v199_v22 = vld [vmem:[%s492_s1 + $0x18] sm:$0xff] (!%p138_p2)  ;;  %v220_v41 = vld [vmem:[%s493_s2 + $0x8] sm:$0xff] (!%p138_p2)  ;;  %v219_v42 = vld [vmem:[%s493_s2] sm:$0xff] (!%p138_p2) }
   0x7   : > { %v222_v44 = vld [vmem:[%s493_s2 + $0x18] sm:$0xff] (!%p138_p2)  ;;  %v221_v45 = vld [vmem:[%s493_s2 + $0x10] sm:$0xff] (!%p138_p2) }
   0xd   : > { %s496_s13 = smov (!%p161_p3, %s334_s13), 1 }
   0xe   : > { %s349_s14 = sshll.u32 %s496_s13, 6 }
   0xf   : > { %s165_s17 = scalar_lea.vmem %s491_s0, %s349_s14  ;;  %s170_s9 = scalar_lea.vmem %s494_s3, %s349_s14 }
  0x10   : > { %v419_v0 = vld [vmem:[%s165_s17] sm:$0xff]  ;;  %v421_v1 = vld [vmem:[%s165_s17 + $0x8] sm:$0xff]  ;;  %v429_v5 = vld [vmem:[%s165_s17 + $0x10] sm:$0xff] }
  0x11   : > { %v423_v2 = vld [vmem:[%s165_s17 + $0x20] sm:$0xff]  ;;  %v179_v3 = vadd.f32 %v421_v1, %v419_v0  ;;  %v427_v4 = vld [vmem:[%s165_s17 + $0x28] sm:$0xff]  ;;  %v431_v6 = vld [vmem:[%s165_s17 + $0x18] sm:$0xff] }
  0x12   : > { %v185_v7 = vadd.f32 %v427_v4, %v423_v2  ;;  %v435_v8 = vld [vmem:[%s165_s17 + $0x30] sm:$0xff]  ;;  %v437_v9 = vld [vmem:[%s165_s17 + $0x38] sm:$0xff]  ;;  %v182_v10 = vadd.f32 %v431_v6, %v429_v5 }
  0x13   : > { %180 = vadd.xlane.f32.xlu0 %v179_v3  ;;  %v188_v11 = vadd.f32 %v437_v9, %v435_v8 }
  0x14   : > { %186 = vadd.xlane.f32.xlu1 %v185_v7 }
  0x17   : > { %183 = vadd.xlane.f32.xlu0 %v182_v10 }
  0x18   : > { %189 = vadd.xlane.f32.xlu1 %v188_v11 }
  0xa0   : > { %v181_v12 = vpop.xlane.xlu0 %180 }
  0xa1   : > { %v192_v13 = vmul.f32 0.00390625, %v181_v12  ;;  %v187_v14 = vpop.xlane.xlu1 %186 }
  0xa2   : > { %v194_v16 = vmul.f32 0.00390625, %v187_v14 }
  0xa3   : > { %v200_v20 = vmul.f32 %v196_v15, %v192_v13 }
  0xa4   : > { %v184_v19 = vpop.xlane.xlu0 %183  ;;  %v202_v25 = vmul.f32 %v198_v17, %v194_v16 }
  0xa5   : > { %v193_v21 = vmul.f32 0.00390625, %v184_v19  ;;  %v190_v23 = vpop.xlane.xlu1 %189  ;;  %v205_v28 = vsel %vm204_vm0, %v200_v20, 0.0 }
  0xa6   : > { %v195_v24 = vmul.f32 0.00390625, %v190_v23  ;;  %v208_v31 = vsel %vm204_vm0, %v202_v25, 0.0 }
  0xa7   : > { %v201_v26 = vmul.f32 %v197_v18, %v193_v21 }
  0xa8   : > { %v203_v27 = vmul.f32 %v199_v22, %v195_v24 }
  0xa9   : > { %v206_v29 = vsel %vm204_vm0, %v201_v26, 0.0 }
  0xaa   : > { %v207_v30 = vadd.f32 %v206_v29, %v205_v28  ;;  %v210_v32 = vsel %vm204_vm0, %v203_v27, 0.0 }
  0xac   : > { %v209_v33 = vadd.f32 %v208_v31, %v207_v30 }
  0xae   : > { %v211_v34 = vadd.f32 %v210_v32, %v209_v33 }
  0xb0   : > { %v212_v35 = vrot.slane %v211_v34, 4 }
  0xb2   : > { %v213_v36 = vadd.f32 %v212_v35, %v211_v34 }
  0xb4   : > { %v214_v37 = vrot.slane %v213_v36, 2 }
  0xb6   : > { %v215_v38 = vadd.f32 %v214_v37, %v213_v36 }
  0xb8   : > { %v216_v39 = vrot.slane %v215_v38, 1 }
  0xba   : > { %v217_v40 = vadd.f32 %v216_v39, %v215_v38 }
  0xbc   : > { %v218_v43 = vmax.f32 %v217_v40, 0.0 }
  0xbe   : > { %v224_v46 = vmul.f32 %v220_v41, %v218_v43  ;;  %v223_v47 = vmul.f32 %v219_v42, %v218_v43  ;;  %v226_v50 = vmul.f32 %v222_v44, %v218_v43  ;;  %v225_v51 = vmul.f32 %v221_v45, %v218_v43 }
  0xc0   : > { %v230_v48 = vsel %vm204_vm0, %v224_v46, 0.0  ;;  %v227_v49 = vsel %vm204_vm0, %v223_v47, 0.0  ;;  %v236_v52 = vsel %vm204_vm0, %v226_v50, 0.0  ;;  %v233_v53 = vsel %vm204_vm0, %v225_v51, 0.0 }
  0xc1   : > { %231 = vadd.xlane.f32.xlu1 %v230_v48  ;;  %228 = vadd.xlane.f32.xlu0 %v227_v49 }
  0xc5   : > { %237 = vadd.xlane.f32.xlu1 %v236_v52  ;;  %234 = vadd.xlane.f32.xlu0 %v233_v53 }
 0x14e   : > { %v232_v54 = vpop.xlane.xlu1 %231  ;;  %v229_v55 = vpop.xlane.xlu0 %228 }
 0x14f   : > { %v344_v56 = vmul.f32 -1.442695, %v232_v54  ;;  %v343_v57 = vmul.f32 -1.442695, %v229_v55 }
 0x151   : > { %359 = vpow2.f32 %v344_v56 }
 0x152   : > { %361 = vpow2.f32 %v343_v57  ;;  %v238_v58 = vpop.xlane.xlu1 %237  ;;  %v235_v59 = vpop.xlane.xlu0 %234 }
 0x153   : > { %v346_v60 = vmul.f32 -1.442695, %v238_v58  ;;  %v345_v61 = vmul.f32 -1.442695, %v235_v59 }
 0x155   : > { %363 = vpow2.f32 %v346_v60 }
 0x156   : > { %365 = vpow2.f32 %v345_v61 }
 0x15b   : > { %v360_v62 = vpop.eup %359 }
 0x15c   : > { %v362_v63 = vpop.eup %361  ;;  %v252_v3 = vadd.f32 1.0, %v360_v62 }
 0x15d   : > { %v251_v7 = vadd.f32 1.0, %v362_v63 }
 0x15e   : > { %367 = vrcp.f32 %v252_v3 }
 0x15f   : > { %v364_v10 = vpop.eup %363  ;;  %369 = vrcp.f32 %v251_v7 }
 0x160   : > { %v366_v11 = vpop.eup %365  ;;  %v254_v12 = vadd.f32 1.0, %v364_v10 }
 0x161   : > { %v253_v13 = vadd.f32 1.0, %v366_v11 }
 0x162   : > { %371 = vrcp.f32 %v254_v12 }
 0x163   : > { %373 = vrcp.f32 %v253_v13 }
 0x168   : > { %v368_v14 = vpop.eup %367 }
 0x169   : > { %v370_v15 = vpop.eup %369  ;;  %v265_v16 = vmul.f32 %v368_v14, %v429_v5  ;;  %v266_v17 = vmul.f32 %v368_v14, %v431_v6 }
 0x16a   : > { %v263_v18 = vmul.f32 %v370_v15, %v419_v0  ;;  %v264_v19 = vmul.f32 %v370_v15, %v421_v1 }
 0x16b   : > { %273 = vst [vmem:[%s170_s9 + $0x10] sm:$0xff] %v265_v16  ;;  %274 = vst [vmem:[%s170_s9 + $0x18] sm:$0xff] %v266_v17 }
 0x16c   : > { %v372_v20 = vpop.eup %371  ;;  %271 = vst [vmem:[%s170_s9] sm:$0xff] %v263_v18  ;;  %272 = vst [vmem:[%s170_s9 + $0x8] sm:$0xff] %v264_v19 }
 0x16d   : > { %v374_v21 = vpop.eup %373  ;;  %v269_v22 = vmul.f32 %v372_v20, %v435_v8  ;;  %v270_v23 = vmul.f32 %v372_v20, %v437_v9 }
 0x16e   : > { %v267_v24 = vmul.f32 %v374_v21, %v423_v2  ;;  %v268_v5 = vmul.f32 %v374_v21, %v427_v4 }
 0x16f   : > { %277 = vst [vmem:[%s170_s9 + $0x30] sm:$0xff] %v269_v22  ;;  %278 = vst [vmem:[%s170_s9 + $0x38] sm:$0xff] %v270_v23 }
 0x170   : > { %275 = vst [vmem:[%s170_s9 + $0x20] sm:$0xff] %v267_v24  ;;  %276 = vst [vmem:[%s170_s9 + $0x28] sm:$0xff] %v268_v5 }
 0x171 PF: > { %s13_s12 = sadd.s32 1, %s381_s12  }
 0x172   : > { %p10_p4 = scmp.ge.s32.totalorder %s13_s12, 4  }
 0x174   :  { %12 = sbr.rel (!%p10_p4) target bundleno = 1 (0x1), region = 62 }

</bundles_post_ra>
